<compile_context>
chip_gen: v6e
topology: v6e:2x2x1
jax: 0.10.0
libtpu: 0.0.40
codegen_flags: <defaults>
</compile_context>

<pallas_src>
import functools

import jax
import jax.numpy as jnp
from jax.experimental import pallas as pl
from jax.experimental.pallas import tpu as pltpu


# ----------------------------------------------------------------------------
# padding helpers
# ----------------------------------------------------------------------------
def _round_up(x, m):
    return ((x + m - 1) // m) * m


def _pad2d_to(x, rows, cols):
    r, c = x.shape
    if rows > r or cols > c:
        x = jnp.pad(x, ((0, max(0, rows - r)), (0, max(0, cols - c))))
    return x


# ----------------------------------------------------------------------------
# generic tiled MXU matmul (guarded writeback, tiles clamped to real dims)
# ----------------------------------------------------------------------------
def _matmul_kernel(a_ref, b_ref, o_ref, acc_ref):
    k = pl.program_id(2)

    @pl.when(k == 0)
    def _():
        acc_ref[...] = jnp.zeros_like(acc_ref)

    acc_ref[...] += jnp.dot(a_ref[...], b_ref[...],
                            preferred_element_type=jnp.float32)

    @pl.when(k == pl.num_programs(2) - 1)
    def _():
        o_ref[...] = acc_ref[...].astype(o_ref.dtype)


def pallas_matmul(a, b, *, tm=512, tn=512, tk=512, out_dtype=jnp.float32):
    M, K = a.shape
    K2, Ncols = b.shape
    assert K == K2
    tm = min(tm, _round_up(M, 8))
    tn = min(tn, _round_up(Ncols, 128))
    tk = min(tk, _round_up(K, 128))
    Mp, Kp, Np = _round_up(M, tm), _round_up(K, tk), _round_up(Ncols, tn)
    a_p = _pad2d_to(a, Mp, Kp)
    b_p = _pad2d_to(b, Kp, Np)
    out = pl.pallas_call(
        _matmul_kernel,
        out_shape=jax.ShapeDtypeStruct((Mp, Np), out_dtype),
        grid_spec=pltpu.PrefetchScalarGridSpec(
            num_scalar_prefetch=0,
            grid=(Mp // tm, Np // tn, Kp // tk),
            in_specs=[
                pl.BlockSpec((tm, tk), lambda i, j, k: (i, k)),
                pl.BlockSpec((tk, tn), lambda i, j, k: (k, j)),
            ],
            out_specs=pl.BlockSpec((tm, tn), lambda i, j, k: (i, j)),
            scratch_shapes=[pltpu.VMEM((tm, tn), jnp.float32)],
        ),
        compiler_params=pltpu.CompilerParams(
            dimension_semantics=("parallel", "parallel", "arbitrary")
        ),
    )(a_p, b_p)
    return out[:M, :Ncols]


# ----------------------------------------------------------------------------
# adjacency pass:  [z | z_a] = adj @ [feat@W1 | feat_a@W1]  with fused ReLU
# ----------------------------------------------------------------------------
def _matmul_relu_kernel(a_ref, b_ref, raw_ref, relu_ref, acc_ref):
    k = pl.program_id(1)

    @pl.when(k == 0)
    def _():
        acc_ref[...] = jnp.zeros_like(acc_ref)

    acc_ref[...] += jnp.dot(a_ref[...], b_ref[...],
                            preferred_element_type=jnp.float32)

    @pl.when(k == pl.num_programs(1) - 1)
    def _():
        acc = acc_ref[...]
        raw_ref[...] = acc.astype(raw_ref.dtype)
        relu_ref[...] = jnp.maximum(acc, 0.0).astype(relu_ref.dtype)


def pallas_spmm_with_relu(adj_p, rhs, n_rows, *, tm, tk):
    """adj_p: pre-padded (Mp, Kp); rhs: (K<=Kp, W).  Returns raw, relu (n_rows, W)."""
    Mp, Kp = adj_p.shape
    assert Mp % tm == 0 and Kp % tk == 0
    K, W = rhs.shape
    Wp = _round_up(W, 128)
    rhs_p = _pad2d_to(rhs, Kp, Wp)
    raw, relu = pl.pallas_call(
        _matmul_relu_kernel,
        out_shape=(jax.ShapeDtypeStruct((Mp, Wp), jnp.float32),
                   jax.ShapeDtypeStruct((Mp, Wp), jnp.float32)),
        grid_spec=pltpu.PrefetchScalarGridSpec(
            num_scalar_prefetch=0,
            grid=(Mp // tm, Kp // tk),
            in_specs=[
                pl.BlockSpec((tm, tk), lambda i, k: (i, k)),
                pl.BlockSpec((tk, Wp), lambda i, k: (k, 0)),
            ],
            out_specs=(pl.BlockSpec((tm, Wp), lambda i, k: (i, 0)),
                       pl.BlockSpec((tm, Wp), lambda i, k: (i, 0))),
            scratch_shapes=[pltpu.VMEM((tm, Wp), jnp.float32)],
        ),
        compiler_params=pltpu.CompilerParams(
            dimension_semantics=("parallel", "arbitrary")
        ),
    )(adj_p, rhs_p)
    return raw[:n_rows, :W], relu[:n_rows, :W]


# ----------------------------------------------------------------------------
# readout pass:  graph_neigh @ [emb | emb_a]  with in-kernel rowsum and fused
# AvgReadout finalize (mean, per-half L2-normalize, sigmoid)
# ----------------------------------------------------------------------------
def _readout_matmul_kernel(a_ref, b_ref, o_ref, acc_ref, rs_ref, *, h):
    k = pl.program_id(1)

    @pl.when(k == 0)
    def _():
        acc_ref[...] = jnp.zeros_like(acc_ref)
        rs_ref[...] = jnp.zeros_like(rs_ref)

    a = a_ref[...]
    acc_ref[...] += jnp.dot(a, b_ref[...], preferred_element_type=jnp.float32)
    rs_ref[...] += jnp.sum(a, axis=1, keepdims=True)

    @pl.when(k == pl.num_programs(1) - 1)
    def _():
        rs = rs_ref[...]                                      # (tm, 1)
        inv_rs = jnp.where(rs > 0.0, 1.0 / rs, 0.0)           # guard padded rows
        ge = acc_ref[...] * inv_rs                            # mean aggregation
        col = jax.lax.broadcasted_iota(jnp.int32, ge.shape, 1)
        in_first = col < h
        in_second = jnp.logical_and(col >= h, col < 2 * h)
        sq = ge * ge
        n1 = jnp.sqrt(jnp.sum(jnp.where(in_first, sq, 0.0), axis=-1, keepdims=True))
        n2 = jnp.sqrt(jnp.sum(jnp.where(in_second, sq, 0.0), axis=-1, keepdims=True))
        inv_n = jnp.where(in_first,
                          1.0 / jnp.maximum(n1, 1e-12),
                          1.0 / jnp.maximum(n2, 1e-12))       # F.normalize(p=2, dim=1)
        gnorm = ge * inv_n
        o_ref[...] = (1.0 / (1.0 + jnp.exp(-gnorm))).astype(o_ref.dtype)   # sigmoid


def pallas_readout_pair(graph_p, emb_cat, h_dim, n_rows, *, tm, tk):
    """graph_p: pre-padded (Mp, Kp); emb_cat: (N, 2*h_dim) = [emb | emb_a]."""
    Mp, Kp = graph_p.shape
    assert Mp % tm == 0 and Kp % tk == 0
    N, W = emb_cat.shape
    Wp = _round_up(W, 128)
    rhs_p = _pad2d_to(emb_cat, Kp, Wp)
    out = pl.pallas_call(
        functools.partial(_readout_matmul_kernel, h=h_dim),
        out_shape=jax.ShapeDtypeStruct((Mp, Wp), jnp.float32),
        grid_spec=pltpu.PrefetchScalarGridSpec(
            num_scalar_prefetch=0,
            grid=(Mp // tm, Kp // tk),
            in_specs=[
                pl.BlockSpec((tm, tk), lambda i, k: (i, k)),
                pl.BlockSpec((tk, Wp), lambda i, k: (k, 0)),
            ],
            out_specs=pl.BlockSpec((tm, Wp), lambda i, k: (i, 0)),
            scratch_shapes=[pltpu.VMEM((tm, Wp), jnp.float32),
                            pltpu.VMEM((tm, 1), jnp.float32)],
        ),
        compiler_params=pltpu.CompilerParams(
            dimension_semantics=("parallel", "arbitrary")
        ),
    )(graph_p, rhs_p)
    g = out[:n_rows, :h_dim]
    g_a = out[:n_rows, h_dim:2 * h_dim]
    return g, g_a


# ----------------------------------------------------------------------------
# fused Discriminator pair (nn.Bilinear(n_h, n_h, 1) per node, both calls)
# W.T lives whole in VMEM; cw / cw_a computed in-kernel; lane-dense output.
# ----------------------------------------------------------------------------
def _disc_kernel(wt_ref, b_ref, g_ref, ga_ref, e_ref, ea_ref, o_ref):
    wt = wt_ref[...]
    cw = jnp.dot(g_ref[...], wt, preferred_element_type=jnp.float32)
    cwa = jnp.dot(ga_ref[...], wt, preferred_element_type=jnp.float32)
    e = e_ref[...]
    ea = ea_ref[...]
    b = b_ref[0, 0]
    sc1 = jnp.sum(e * cw, axis=-1, keepdims=True) + b      # ret[:, 0]
    sc2 = jnp.sum(ea * cw, axis=-1, keepdims=True) + b     # ret[:, 1]
    sc1a = jnp.sum(ea * cwa, axis=-1, keepdims=True) + b   # ret_a[:, 0]
    sc2a = jnp.sum(e * cwa, axis=-1, keepdims=True) + b    # ret_a[:, 1]
    col = jax.lax.broadcasted_iota(jnp.int32, o_ref.shape, 1)
    out = jnp.where(col == 0, sc1,
          jnp.where(col == 1, sc2,
          jnp.where(col == 2, sc1a,
          jnp.where(col == 3, sc2a, 0.0))))
    o_ref[...] = out.astype(o_ref.dtype)


def pallas_discriminator_pair(g, g_a, emb, emb_a, weight, bias, *, tile_n=2048):
    """g, g_a, emb, emb_a: (N, H); weight: (1, H, H); bias: (1,).
    Returns ret (N,2) = disc(g, emb, emb_a) and ret_a (N,2) = disc(g_a, emb_a, emb)."""
    N, H = emb.shape
    Hp = _round_up(H, 128)
    tile_n = min(tile_n, _round_up(N, 8))
    Np = _round_up(N, tile_n)
    wt = _pad2d_to(weight.reshape(H, H).T, Hp, Hp)        # cw = c @ W.T
    g_p = _pad2d_to(g, Np, Hp)
    ga_p = _pad2d_to(g_a, Np, Hp)
    e_p = _pad2d_to(emb, Np, Hp)
    ea_p = _pad2d_to(emb_a, Np, Hp)
    b11 = jnp.asarray(bias, jnp.float32).reshape(1, 1)
    out = pl.pallas_call(
        _disc_kernel,
        out_shape=jax.ShapeDtypeStruct((Np, 128), jnp.float32),
        grid_spec=pltpu.PrefetchScalarGridSpec(
            num_scalar_prefetch=0,
            grid=(Np // tile_n,),
            in_specs=[
                pl.BlockSpec((Hp, Hp), lambda i: (0, 0)),                 # W.T resident
                pl.BlockSpec(memory_space=pltpu.MemorySpace.SMEM),        # scalar bias
                pl.BlockSpec((tile_n, Hp), lambda i: (i, 0)),
                pl.BlockSpec((tile_n, Hp), lambda i: (i, 0)),
                pl.BlockSpec((tile_n, Hp), lambda i: (i, 0)),
                pl.BlockSpec((tile_n, Hp), lambda i: (i, 0)),
            ],
            out_specs=pl.BlockSpec((tile_n, 128), lambda i: (i, 0)),
        ),
        compiler_params=pltpu.CompilerParams(dimension_semantics=("parallel",)),
    )(wt, b11, g_p, ga_p, e_p, ea_p)
    ret = out[:N, 0:2]
    ret_a = out[:N, 2:4]
    return ret, ret_a


# ----------------------------------------------------------------------------
# Encoder_sparse forward
# ----------------------------------------------------------------------------
def encoder_sparse_forward(feat, feat_a, adj, graph_neigh, params):
    w1 = params["weight1"]
    w2 = params["weight2"]
    wb = params["disc_weight"]
    bb = params["disc_bias"]

    # TODO(synk): training-mode F.dropout not implemented (module default p=0.0 -> identity).
    # TODO(synk): torch.spmm takes a sparse adjacency; implemented as a dense tiled matmul.
    N = feat.shape[0]
    H = w1.shape[1]

    # Tile sizes for the N x N passes; pad adj / graph_neigh once and reuse.
    tm = min(512, _round_up(N, 8))
    tk = min(512, _round_up(N, 128))
    Mp = _round_up(N, tm)
    Kp = _round_up(N, tk)
    adj_p = _pad2d_to(adj, Mp, Kp)
    gn_p = _pad2d_to(graph_neigh, Mp, Kp)

    # feature transforms (small matmuls on the generic kernel)
    fw = pallas_matmul(feat, w1)                      # (N, H)
    fwa = pallas_matmul(feat_a, w1)                   # (N, H)
    rhs = jnp.concatenate([fw, fwa], axis=1)          # (N, 2H)

    # single adjacency pass -> [z | z_a] and relu thereof
    zz, emb_cat = pallas_spmm_with_relu(adj_p, rhs, N, tm=tm, tk=tk)
    z = zz[:, :H]                                     # hiden_emb
    emb = emb_cat[:, :H]
    emb_a = emb_cat[:, H:2 * H]

    # h = adj @ (z @ W2)   (reuses the already-padded adjacency)
    zw2 = pallas_matmul(z, w2)                        # (N, in)
    zw2_p = _pad2d_to(zw2, Kp, zw2.shape[1])
    h = pallas_matmul(adj_p, zw2_p, tm=tm, tk=tk)[:N, :]

    # single readout pass -> g, g_a (mean / l2norm / sigmoid fused in epilogue)
    g, g_a = pallas_readout_pair(gn_p, emb_cat, H, N, tm=tm, tk=tk)

    # fused discriminator pair
    ret, ret_a = pallas_discriminator_pair(g, g_a, emb, emb_a, wb, bb)
    return z, h, ret, ret_a


# ----------------------------------------------------------------------------
# parameter init (mirrors torch xavier_uniform_ / zero bias)
# ----------------------------------------------------------------------------
def init_encoder_params(key, in_features, out_features):
    k1, k2, k3 = jax.random.split(key, 3)

    def xavier(k, shape, fan_in, fan_out):
        bound = float(jnp.sqrt(6.0 / (fan_in + fan_out)))
        return jax.random.uniform(k, shape, jnp.float32, -bound, bound)

    w1 = xavier(k1, (in_features, out_features), in_features, out_features)
    w2 = xavier(k2, (out_features, in_features), out_features, in_features)
    # nn.Bilinear(n_h, n_h, 1): weight (1, n_h, n_h); torch fan_in=n_h*n_h, fan_out=n_h
    wb = xavier(k3, (1, out_features, out_features),
                out_features * out_features, out_features)
    bb = jnp.zeros((1,), jnp.float32)
    return {"weight1": w1, "weight2": w2, "disc_weight": wb, "disc_bias": bb}


# ----------------------------------------------------------------------------
# pure-JAX reference mirroring the torch module
# ----------------------------------------------------------------------------
def _reference_forward(feat, feat_a, adj, graph_neigh, params):
    w1 = params["weight1"]
    w2 = params["weight2"]
    wb = params["disc_weight"][0]
    bb = params["disc_bias"][0]

    z = adj @ (feat @ w1)
    hiden_emb = z
    h = adj @ (z @ w2)
    emb = jnp.maximum(z, 0.0)
    z_a = adj @ (feat_a @ w1)
    emb_a = jnp.maximum(z_a, 0.0)

    def readout(e):
        vsum = graph_neigh @ e
        rs = jnp.sum(graph_neigh, axis=1, keepdims=True)
        ge = vsum / rs
        ge = ge / jnp.maximum(jnp.linalg.norm(ge, axis=1, keepdims=True), 1e-12)
        return jax.nn.sigmoid(ge)

    def disc(c, hp, hm):
        cw = c @ wb.T
        s1 = jnp.sum(hp * cw, axis=1, keepdims=True) + bb
        s2 = jnp.sum(hm * cw, axis=1, keepdims=True) + bb
        return jnp.concatenate([s1, s2], axis=1)

    g = readout(emb)
    g_a = readout(emb_a)
    return hiden_emb, h, disc(g, emb, emb_a), disc(g_a, emb_a, emb)


if __name__ == "__main__":
    N, in_features, out_features = 64, 48, 32

    key = jax.random.PRNGKey(0)
    k_p, k_f, k_fa, k_adj = jax.random.split(key, 4)

    params = init_encoder_params(k_p, in_features, out_features)

    feat = jax.random.normal(k_f, (N, in_features), jnp.float32)
    feat_a = jax.random.normal(k_fa, (N, in_features), jnp.float32)

    # random symmetric neighborhood graph with self-loops
    probs = jax.random.uniform(k_adj, (N, N))
    A = (probs < 0.15).astype(jnp.float32)
    A = jnp.maximum(A, A.T)
    A = A * (1.0 - jnp.eye(N, dtype=jnp.float32)) + jnp.eye(N, dtype=jnp.float32)
    graph_neigh = A
    adj = A / jnp.sum(A, axis=1, keepdims=True)   # row-normalized dense adjacency

    outs = encoder_sparse_forward(feat, feat_a, adj, graph_neigh, params)
    outs = jax.block_until_ready(outs)
    hiden_emb, h, ret, ret_a = outs

    assert hiden_emb.shape == (N, out_features)
    assert h.shape == (N, in_features)
    assert ret.shape == (N, 2) and ret_a.shape == (N, 2)

    refs = _reference_forward(feat, feat_a, adj, graph_neigh, params)
    for name, got, want in zip(("hiden_emb", "h", "ret", "ret_a"), outs, refs):
        assert jnp.allclose(got, want, atol=1e-4, rtol=1e-4), name

    print("KERNEL_OK")
</pallas_src>

<mosaic_0001>
module attributes {stable_mosaic.version = 11 : i64} {
  func.func @_matmul_kernel(%arg0: i32, %arg1: i32, %arg2: i32, %arg3: memref<64x128xf32, #tpu.memory_space<vmem>>, %arg4: memref<128x128xf32, #tpu.memory_space<vmem>>, %arg5: memref<64x128xf32, #tpu.memory_space<vmem>>, %arg6: memref<64x128xf32, #tpu.memory_space<vmem>>) attributes {dimension_semantics = [#tpu.dimension_semantics<parallel>, #tpu.dimension_semantics<parallel>, #tpu.dimension_semantics<arbitrary>], iteration_bounds = array<i64: 1, 1, 1>, scalar_prefetch = 0 : i64, scratch_operands = 1 : i64, tpu.core_type = #tpu.core_type<tc>, window_params = [{transform_indices = @transform_0, window_bounds = array<i64: 64, 128>}, {transform_indices = @transform_1, window_bounds = array<i64: 128, 128>}, {transform_indices = @transform_2, window_bounds = array<i64: 64, 128>}]} {
    %c0_i32 = arith.constant 0 : i32
    %0 = arith.cmpi eq, %arg2, %c0_i32 : i32
    %1 = arith.extui %0 : i1 to i32
    %c0_i32_0 = arith.constant 0 : i32
    %2 = arith.cmpi ne, %1, %c0_i32_0 : i32
    scf.if %2 {
      %cst_10 = arith.constant 0.000000e+00 : f32
      %12 = vector.broadcast %cst_10 : f32 to vector<64x128xf32>
      %c0_11 = arith.constant 0 : index
      %c0_12 = arith.constant 0 : index
      %13 = vector.load %arg6[%c0_11, %c0_12] : memref<64x128xf32, #tpu.memory_space<vmem>>, vector<64x128xf32>
      tpu.vector_store %arg6[%c0_11, %c0_12], %12 {strides = array<i32>} : memref<64x128xf32, #tpu.memory_space<vmem>>, vector<64x128xf32>,
    } else {
    }
    %c0 = arith.constant 0 : index
    %c0_1 = arith.constant 0 : index
    %3 = vector.load %arg6[%c0, %c0_1] : memref<64x128xf32, #tpu.memory_space<vmem>>, vector<64x128xf32>
    %c0_2 = arith.constant 0 : index
    %c0_3 = arith.constant 0 : index
    %4 = vector.load %arg3[%c0_2, %c0_3] : memref<64x128xf32, #tpu.memory_space<vmem>>, vector<64x128xf32>
    %c0_4 = arith.constant 0 : index
    %c0_5 = arith.constant 0 : index
    %5 = vector.load %arg4[%c0_4, %c0_5] : memref<128x128xf32, #tpu.memory_space<vmem>>, vector<128x128xf32>
    %cst = arith.constant dense<0.000000e+00> : vector<64x128xf32>
    %6 = tpu.matmul %4, %5, %cst {dimension_numbers = #tpu.dot_dimension_numbers<[1], [0], [0], [1], [0, 0, 1, 1], [], []>} : vector<64x128xf32>, vector<128x128xf32>, vector<64x128xf32> -> vector<64x128xf32>
    %7 = arith.addf %3, %6 : vector<64x128xf32>
    %c0_6 = arith.constant 0 : index
    %c0_7 = arith.constant 0 : index
    %8 = vector.load %arg6[%c0_6, %c0_7] : memref<64x128xf32, #tpu.memory_space<vmem>>, vector<64x128xf32>
    tpu.vector_store %arg6[%c0_6, %c0_7], %7 {strides = array<i32>} : memref<64x128xf32, #tpu.memory_space<vmem>>, vector<64x128xf32>,
    %c0_i32_8 = arith.constant 0 : i32
    %9 = arith.cmpi eq, %arg2, %c0_i32_8 : i32
    %10 = arith.extui %9 : i1 to i32
    %c0_i32_9 = arith.constant 0 : i32
    %11 = arith.cmpi ne, %10, %c0_i32_9 : i32
    scf.if %11 {
      %c0_10 = arith.constant 0 : index
      %c0_11 = arith.constant 0 : index
      %12 = vector.load %arg6[%c0_10, %c0_11] : memref<64x128xf32, #tpu.memory_space<vmem>>, vector<64x128xf32>
      %c0_12 = arith.constant 0 : index
      %c0_13 = arith.constant 0 : index
      %13 = vector.load %arg5[%c0_12, %c0_13] : memref<64x128xf32, #tpu.memory_space<vmem>>, vector<64x128xf32>
      tpu.vector_store %arg5[%c0_12, %c0_13], %12 {strides = array<i32>} : memref<64x128xf32, #tpu.memory_space<vmem>>, vector<64x128xf32>,
    } else {
    }
    return
  }
  func.func @transform_0(%arg0: i32, %arg1: i32, %arg2: i32) -> (i32, i32) {
    %c0_i32 = arith.constant 0 : i32
    return %arg0, %arg2 : i32, i32
  }
  func.func @transform_1(%arg0: i32, %arg1: i32, %arg2: i32) -> (i32, i32) {
    %c0_i32 = arith.constant 0 : i32
    return %arg2, %arg1 : i32, i32
  }
  func.func @transform_2(%arg0: i32, %arg1: i32, %arg2: i32) -> (i32, i32) {
    %c0_i32 = arith.constant 0 : i32
    return %arg0, %arg1 : i32, i32
  }
}

</mosaic_0001>

<bundles_post_ra>
// kernel: tpu_custom_call.1
= control target key start
LH: loop header
LB: loop body
LE: loop exit
PB: predicated region body
PF: predicated region fallthrough
CT: control target
= control target key end

     0   :  { %7 = vsyncpa [#allocation4], 0  ;;  %s451_s0 = inlined_call_operand.hbm [shape: f32[64,128], index: 0, kind: input, shape index: {}]   ;;  %s452_s1 = inlined_call_operand.hbm [shape: f32[128,128], index: 1, kind: input, shape index: {}]   ;;  %s453_s2 = inlined_call_operand.hbm [shape: f32[64,128], index: 2, kind: output, shape index: {}]  }
   0x1   :  { %8 = vsyncpa [#allocation7], 0 }
   0x2   :  { %9 = vsyncpa [#allocation5], 0  ;;  %s413_s9 = smov [#allocation3]  }
   0x3   :  { %s15_s10 = sshll.u32 %s413_s9, 4  ;;  %s16_s10 = int_to_ptr.vmem [resolvable:$true] %s15_s10 }
   0x4   :  { %s355_s11 = scalar_lea.vmem %s16_s10, 1024  ;;  %p360_p1 = scmp.lt.s32.totalorder %s16_s10, %s16_s10 }
   0x5   :  { %p356_p0 = scmp.ne.s32.totalorder %s16_s10, %s355_s11  ;;  %p361_p2 = scmp.lt.s32.totalorder %s355_s11, %s355_s11 }
   0x7   :  { %p362_p3 = por %p361_p2, %p360_p1 }
   0x9   :  { %p363_p4 = pnand %p362_p3, %p356_p0 }
   0xb   :  { %366 = shalt.err (!%p363_p4)
}
   0xc   :  { %s414_s12 = smov 128   ;;  %s415_s13 = smov 8  }
   0xd   :  { %21 = dma.hbm_to_vmem [thread:$0]  %s451_s0, 1024, %s16_s10, [#allocation4], %s414_s12, %s414_s12, %s415_s13  }
   0xe   :  { %s416_s16 = smov [#allocation6]  }
   0xf   :  { %s27_s17 = sshll.u32 %s416_s16, 4  ;;  %s28_s17 = int_to_ptr.vmem [resolvable:$true] %s27_s17 }
  0x10   :  { %s375_s18 = scalar_lea.vmem %s28_s17, 2048  ;;  %p380_p6 = scmp.lt.s32.totalorder %s28_s17, %s28_s17 }
  0x11   :  { %p376_p5 = scmp.ne.s32.totalorder %s28_s17, %s375_s18  ;;  %p381_p7 = scmp.lt.s32.totalorder %s375_s18, %s375_s18 }
  0x13   :  { %p382_p8 = por %p381_p7, %p380_p6 }
  0x15   :  { %p383_p9 = pnand %p382_p8, %p376_p5 }
  0x17   :  { %386 = shalt.err (!%p383_p9)
}
  0x18   :  { %33 = dma.hbm_to_vmem [thread:$0]  %s452_s1, 2048, %s28_s17, [#allocation7], %s414_s12, %s414_s12, %s415_s13  }
  0x19   :  { %407 = dma.done.wait [#allocation4], 1024  }
  0x1a   :  { %408 = vsyncadd [#allocation4], 4294966272 }
  0x1b   :  { %409 = dma.done.wait [#allocation7], 2048  }
  0x1c   :  { %410 = vsyncadd [#allocation7], 4294965248  ;;  %v83_v0 = vld [vmem:[#allocation6 + $0x78] sm:$0xff]  ;;  %v82_v1 = vld [vmem:[#allocation6 + $0x70] sm:$0xff]  ;;  %s417_s0 = smov [#allocation8]  }
  0x1d   :  { %266 = vmatprep.subr.mxu0 %v83_v0  ;;  %310 = vmatprep.subr.mxu1 %v83_v0  ;;  %v81_v2 = vld [vmem:[#allocation6 + $0x68] sm:$0xff]  ;;  %v80_v3 = vld [vmem:[#allocation6 + $0x60] sm:$0xff]  ;;  %v79_v4 = vld [vmem:[#allocation6 + $0x58] sm:$0xff]  ;;  %s229_s1 = sshll.u32 %s417_s0, 4  ;;  %s230_s1 = int_to_ptr.vmem [resolvable:$true] %s229_s1 }
  0x1e   :  { %267 = vmatpush3.msra.mxu0 %v83_v0  ;;  %326 = vmatpush3.msra.mxu1 %v83_v0  ;;  %v78_v5 = vld [vmem:[#allocation6 + $0x50] sm:$0xff]  ;;  %v77_v6 = vld [vmem:[#allocation6 + $0x48] sm:$0xff]  ;;  %v76_v7 = vld [vmem:[#allocation6 + $0x40] sm:$0xff]  ;;  %s387_s21 = scalar_lea.vmem %s230_s1, 1024  ;;  %p392_p11 = scmp.lt.s32.totalorder %s230_s1, %s230_s1 }
  0x1f   :  { %268 = vmatprep.subr.mxu0 %v82_v1  ;;  %311 = vmatprep.subr.mxu1 %v82_v1  ;;  %v75_v8 = vld [vmem:[#allocation6 + $0x38] sm:$0xff]  ;;  %v74_v9 = vld [vmem:[#allocation6 + $0x30] sm:$0xff]  ;;  %v73_v10 = vld [vmem:[#allocation6 + $0x28] sm:$0xff]  ;;  %p388_p10 = scmp.ne.s32.totalorder %s230_s1, %s387_s21  ;;  %p393_p12 = scmp.lt.s32.totalorder %s387_s21, %s387_s21 }
  0x20   :  { %269 = vmatpush3.msra.mxu0 %v82_v1  ;;  %327 = vmatpush3.msra.mxu1 %v82_v1  ;;  %v72_v11 = vld [vmem:[#allocation6 + $0x20] sm:$0xff]  ;;  %v71_v12 = vld [vmem:[#allocation6 + $0x18] sm:$0xff]  ;;  %v70_v13 = vld [vmem:[#allocation6 + $0x10] sm:$0xff] }
  0x21   :  { %270 = vmatprep.subr.mxu0 %v81_v2  ;;  %312 = vmatprep.subr.mxu1 %v81_v2  ;;  %v69_v14 = vld [vmem:[#allocation6 + $0x8] sm:$0xff]  ;;  %v68_v15 = vld [vmem:[#allocation6] sm:$0xff]  ;;  %v62_v20 = vld [vmem:[#allocation3 + $0x10] sm:$0xff]  ;;  %p394_p13 = por %p393_p12, %p392_p11 }
  0x22   :  { %271 = vmatpush3.msra.mxu0 %v81_v2  ;;  %328 = vmatpush3.msra.mxu1 %v81_v2  ;;  %v60_v16 = vld [vmem:[#allocation3] sm:$0xff]  ;;  %v61_v18 = vld [vmem:[#allocation3 + $0x8] sm:$0xff]  ;;  %v66_v21 = vld [vmem:[#allocation3 + $0x30] sm:$0xff] }
  0x23   :  { %272 = vmatprep.subr.mxu0 %v80_v3  ;;  %313 = vmatprep.subr.mxu1 %v80_v3  ;;  %v64_v17 = vld [vmem:[#allocation3 + $0x20] sm:$0xff]  ;;  %v65_v19 = vld [vmem:[#allocation3 + $0x28] sm:$0xff]  ;;  %v63_v22 = vld [vmem:[#allocation3 + $0x18] sm:$0xff]  ;;  %p395_p0 = pnand %p394_p13, %p388_p10 }
  0x24   :  { %273 = vmatpush3.msra.mxu0 %v80_v3  ;;  %329 = vmatpush3.msra.mxu1 %v80_v3  ;;  %v67_v23 = vld [vmem:[#allocation3 + $0x38] sm:$0xff] }
  0x25   :  { %274 = vmatprep.subr.mxu0 %v79_v4  ;;  %314 = vmatprep.subr.mxu1 %v79_v4 }
  0x26   :  { %275 = vmatpush3.msra.mxu0 %v79_v4  ;;  %330 = vmatpush3.msra.mxu1 %v79_v4 }
  0x27   :  { %276 = vmatprep.subr.mxu0 %v78_v5  ;;  %315 = vmatprep.subr.mxu1 %v78_v5 }
  0x28   :  { %277 = vmatpush3.msra.mxu0 %v78_v5  ;;  %331 = vmatpush3.msra.mxu1 %v78_v5 }
  0x29   :  { %278 = vmatprep.subr.mxu0 %v77_v6  ;;  %316 = vmatprep.subr.mxu1 %v77_v6 }
  0x2a   :  { %279 = vmatpush3.msra.mxu0 %v77_v6  ;;  %332 = vmatpush3.msra.mxu1 %v77_v6 }
  0x2b   :  { %280 = vmatprep.subr.mxu0 %v76_v7  ;;  %317 = vmatprep.subr.mxu1 %v76_v7 }
  0x2c   :  { %281 = vmatpush3.msra.mxu0 %v76_v7  ;;  %333 = vmatpush3.msra.mxu1 %v76_v7 }
  0x2d   :  { %282 = vmatprep.subr.mxu0 %v75_v8  ;;  %318 = vmatprep.subr.mxu1 %v75_v8 }
  0x2e   :  { %283 = vmatpush3.msra.mxu0 %v75_v8  ;;  %334 = vmatpush3.msra.mxu1 %v75_v8 }
  0x2f   :  { %284 = vmatprep.subr.mxu0 %v74_v9  ;;  %319 = vmatprep.subr.mxu1 %v74_v9 }
  0x30   :  { %285 = vmatpush3.msra.mxu0 %v74_v9  ;;  %335 = vmatpush3.msra.mxu1 %v74_v9 }
  0x31   :  { %286 = vmatprep.subr.mxu0 %v73_v10  ;;  %320 = vmatprep.subr.mxu1 %v73_v10 }
  0x32   :  { %287 = vmatpush3.msra.mxu0 %v73_v10  ;;  %336 = vmatpush3.msra.mxu1 %v73_v10 }
  0x33   :  { %288 = vmatprep.subr.mxu0 %v72_v11  ;;  %321 = vmatprep.subr.mxu1 %v72_v11 }
  0x34   :  { %289 = vmatpush3.msra.mxu0 %v72_v11  ;;  %337 = vmatpush3.msra.mxu1 %v72_v11 }
  0x35   :  { %290 = vmatprep.subr.mxu0 %v71_v12  ;;  %322 = vmatprep.subr.mxu1 %v71_v12 }
  0x36   :  { %291 = vmatpush3.msra.mxu0 %v71_v12  ;;  %338 = vmatpush3.msra.mxu1 %v71_v12 }
  0x37   :  { %292 = vmatprep.subr.mxu0 %v70_v13  ;;  %323 = vmatprep.subr.mxu1 %v70_v13 }
  0x38   :  { %293 = vmatpush3.msra.mxu0 %v70_v13  ;;  %339 = vmatpush3.msra.mxu1 %v70_v13 }
  0x39   :  { %294 = vmatprep.subr.mxu0 %v69_v14  ;;  %324 = vmatprep.subr.mxu1 %v69_v14 }
  0x3a   :  { %295 = vmatpush3.msra.mxu0 %v69_v14  ;;  %340 = vmatpush3.msra.mxu1 %v69_v14 }
  0x3b   :  { %296 = vmatprep.subr.mxu0 %v68_v15  ;;  %325 = vmatprep.subr.mxu1 %v68_v15 }
  0x3c   :  { %297 = vmatpush3.msra.mxu0 %v68_v15  ;;  %341 = vmatpush3.msra.mxu1 %v68_v15 }
  0x3d   :  { %298 = vmatprep.mubr.f32.mxu0 %v60_v16  ;;  %304 = vmatprep.mubr.f32.mxu1 %v64_v17 }
  0x3e   :  { %299 = vmatmul.mubr.f32.vlgmr.msra.gmra.mxu0 %v61_v18  ;;  %305 = vmatmul.mubr.f32.vlgmr.msra.gmra.mxu1 %v65_v19 }
  0x3f   :  { %301 = vmatprep.mubr.f32.mxu0 %v62_v20  ;;  %307 = vmatprep.mubr.f32.mxu1 %v66_v21 }
  0x42   :  { %302 = vmatmul.mubr.f32.gmra.mxu0 %v63_v22  ;;  %308 = vmatmul.mubr.f32.gmra.mxu1 %v67_v23 }
  0xfe   :  { %v300_v24 = vpop.f32.mrf.mxu0  ;;  %v306_v25 = vpop.f32.mrf.mxu1 }
  0xff   :  { %217 = vst [vmem:[#allocation8 + $0x8] sm:$0xff] %v300_v24  ;;  %221 = vst [vmem:[#allocation8 + $0x28] sm:$0xff] %v306_v25 }
 0x100   :  { %v150_v26 = vpop.f32.mrf.mxu0  ;;  %v170_v27 = vpop.f32.mrf.mxu1 }
 0x101   :  { %216 = vst [vmem:[#allocation8] sm:$0xff] %v150_v26  ;;  %220 = vst [vmem:[#allocation8 + $0x20] sm:$0xff] %v170_v27 }
 0x102   :  { %v303_v28 = vpop.f32.mrf.mxu0  ;;  %v309_v29 = vpop.f32.mrf.mxu1 }
 0x103   :  { %219 = vst [vmem:[#allocation8 + $0x18] sm:$0xff] %v303_v28  ;;  %223 = vst [vmem:[#allocation8 + $0x38] sm:$0xff] %v309_v29 }
 0x104   :  { %v160_v30 = vpop.f32.mrf.mxu0  ;;  %v180_v31 = vpop.f32.mrf.mxu1 }
 0x105   :  { %218 = vst [vmem:[#allocation8 + $0x10] sm:$0xff] %v160_v30  ;;  %222 = vst [vmem:[#allocation8 + $0x30] sm:$0xff] %v180_v31 }
 0x106   :  { %398 = shalt.err (!%p395_p0)
}
 0x107   :  { %235 = dma.vmem_to_hbm [thread:$0]  %s230_s1, 1024, %s453_s2, [#allocation5], %s414_s12, %s414_s12, %s415_s13  }
 0x108   :  { %411 = dma.done.wait [#allocation5], 1024  }
 0x109   :  { %412 = vsyncadd [#allocation5], 4294966272 }
 0x10a   :  { %239 = vsyncpa [#allocation4], 1 }
 0x10b   :  { %240 = vsyncpa [#allocation7], 1 }
 0x10c   :  { %241 = vsyncpa [#allocation5], 1 }

</bundles_post_ra>
